<compile_context>
chip_gen: v7x
topology: tpu7x:2x2x1
jax: 0.10.0
libtpu: 0.0.40
codegen_flags: <defaults>
</compile_context>

<pallas_src>
import functools

import jax
import jax.numpy as jnp
from jax.experimental import pallas as pl
from jax.experimental.pallas import tpu as pltpu

IN_F = 28 * 28          # 784 (kept unpadded; last block dim == full array dim)
HID = 128
OUT_F = 10
OUT_F_PAD = 128         # lane-dense output width


def _round_up(n, m):
    return ((n + m - 1) // m) * m


def _choose_tb(batch):
    """Batch-tile heuristic (all sizes are Python ints / trace-time static).

    - tiny batches: one tile sized to the batch (rounded to sublane multiple),
      so almost no padded rows are fetched or computed.
    - larger batches: aim for >= 2 grid steps (v7x dual-TensorCore sharding +
      DMA/compute overlap), ~8 steps for big batches, tile in [256, 1024]
      (f32 x double-buffers stay well under v5e's 16 MiB scoped VMEM).
    """
    b8 = _round_up(max(batch, 1), 8)
    if b8 <= 256:
        return b8
    tb = _round_up(pl.cdiv(batch, 8), 256)
    return max(256, min(tb, 1024))


def simplenet_kernel(x_ref, w1_ref, b1_ref, w2_ref, b2_ref, o_ref):
    # In-kernel bf16 cast of the f32 input tile (VPU) -> MXU fc1 matmul with
    # f32 accumulation: (tb, 784)bf16 @ (784, 128)bf16 -> (tb, 128)f32.
    x = x_ref[...].astype(jnp.bfloat16)
    h = jnp.dot(x, w1_ref[...], preferred_element_type=jnp.float32)
    # bias + ReLU on the VPU, in f32.
    h = jnp.maximum(h + b1_ref[...], 0.0)
    # fc2: (tb, 128)bf16 @ (128, 128)bf16 -> f32 (columns 10..127 are zero).
    o = jnp.dot(h.astype(jnp.bfloat16), w2_ref[...],
                preferred_element_type=jnp.float32)
    # Lane-dense (tb, 128) bf16 store -> unmasked vst, half the writeback.
    o_ref[...] = (o + b2_ref[...]).astype(o_ref.dtype)


def pack_params(w1, b1, w2, b2):
    """Cast/pad params to the kernel's layout: bf16 weights, f32 biases,
    fc2 zero-padded to 128 output columns (lane-dense store)."""
    w1p = w1.astype(jnp.bfloat16)                                   # (784, 128)
    b1p = b1.reshape(1, HID).astype(jnp.float32)                    # (1, 128)
    w2p = jnp.zeros((HID, OUT_F_PAD), jnp.bfloat16).at[:, :OUT_F].set(
        w2.astype(jnp.bfloat16))                                    # (128, 128)
    b2p = jnp.zeros((1, OUT_F_PAD), jnp.float32).at[:, :OUT_F].set(
        b2.reshape(1, OUT_F).astype(jnp.float32))                   # (1, 128)
    return w1p, b1p, w2p, b2p


@functools.partial(jax.jit, static_argnames=("tb",))
def simplenet_forward(x, w1p, b1p, w2p, b2p, *, tb=None):
    """x: (B, 1, 28, 28) or (B, 784) float32 -> logits (B, 10) float32."""
    x2d = x.reshape(-1, IN_F).astype(jnp.float32)
    B = x2d.shape[0]

    if tb is None:
        tb = _choose_tb(B)
    grid = (pl.cdiv(B, tb),)
    rows = grid[0] * tb          # rows actually processed (last tile masked)

    flops = 2 * rows * (IN_F * HID + HID * OUT_F_PAD)
    bytes_accessed = (B * IN_F * 4                                  # x (f32)
                      + B * OUT_F_PAD * 2                           # out (bf16)
                      + (IN_F * HID + HID * OUT_F_PAD) * 2          # weights
                      + (HID + OUT_F_PAD) * 4)                      # biases

    out = pl.pallas_call(
        simplenet_kernel,
        out_shape=jax.ShapeDtypeStruct((B, OUT_F_PAD), jnp.bfloat16),
        grid=grid,
        in_specs=[
            # x tile: last block dim == full array dim (784), tb % 8 == 0.
            pl.BlockSpec((tb, IN_F), lambda i: (i, 0)),
            pl.BlockSpec((IN_F, HID), lambda i: (0, 0)),       # w1 (resident)
            pl.BlockSpec((1, HID), lambda i: (0, 0)),          # b1 (resident)
            pl.BlockSpec((HID, OUT_F_PAD), lambda i: (0, 0)),  # w2 (resident)
            pl.BlockSpec((1, OUT_F_PAD), lambda i: (0, 0)),    # b2 (resident)
        ],
        out_specs=pl.BlockSpec((tb, OUT_F_PAD), lambda i: (i, 0)),
        compiler_params=pltpu.CompilerParams(
            dimension_semantics=("parallel",),   # shard batch across TCs (v7x)
        ),
        cost_estimate=pl.CostEstimate(
            flops=flops, transcendentals=0, bytes_accessed=bytes_accessed),
    )(x2d, w1p, b1p, w2p, b2p)

    # Slice away padded columns; return f32 logits to match the PyTorch module.
    return out[:, :OUT_F].astype(jnp.float32)


def init_params(key):
    """Deterministic init mimicking PyTorch nn.Linear defaults:
    U(-1/sqrt(fan_in), 1/sqrt(fan_in)) for both weight and bias."""
    k1, k2, k3, k4 = jax.random.split(key, 4)
    lim1 = 1.0 / jnp.sqrt(jnp.float32(IN_F))
    lim2 = 1.0 / jnp.sqrt(jnp.float32(HID))
    # stored as (in, out): forward computes x @ W + b
    w1 = jax.random.uniform(k1, (IN_F, HID), jnp.float32, -lim1, lim1)
    b1 = jax.random.uniform(k2, (1, HID), jnp.float32, -lim1, lim1)
    w2 = jax.random.uniform(k3, (HID, OUT_F), jnp.float32, -lim2, lim2)
    b2 = jax.random.uniform(k4, (1, OUT_F), jnp.float32, -lim2, lim2)
    return w1, b1, w2, b2


if __name__ == "__main__":
    key = jax.random.PRNGKey(0)
    k_params, k_x = jax.random.split(key)
    w1, b1, w2, b2 = init_params(k_params)
    w1p, b1p, w2p, b2p = pack_params(w1, b1, w2, b2)

    # small MNIST-like batch: (B=2, C=1, H=28, W=28), NCHW
    x = jax.random.normal(k_x, (2, 1, 28, 28), jnp.float32)

    out = simplenet_forward(x, w1p, b1p, w2p, b2p)
    out = jax.block_until_ready(out)

    # sanity check against plain-JAX f32 reference (bf16 matmuls -> looser tol)
    ref = jnp.maximum(x.reshape(-1, IN_F) @ w1 + b1, 0.0) @ w2 + b2
    assert out.shape == (2, OUT_F)
    assert jnp.allclose(out, ref, atol=5e-2, rtol=5e-2), (
        float(jnp.max(jnp.abs(out - ref))))

    print("KERNEL_OK")
</pallas_src>

<mosaic_0001>
module attributes {stable_mosaic.version = 11 : i64} {
  func.func @simplenet_kernel(%arg0: i32, %arg1: memref<8x784xf32, #tpu.memory_space<vmem>>, %arg2: memref<784x128xbf16, #tpu.memory_space<vmem>>, %arg3: memref<1x128xf32, #tpu.memory_space<vmem>>, %arg4: memref<128x128xbf16, #tpu.memory_space<vmem>>, %arg5: memref<1x128xf32, #tpu.memory_space<vmem>>, %arg6: memref<8x128xbf16, #tpu.memory_space<vmem>>) attributes {dimension_semantics = [#tpu.dimension_semantics<parallel>], iteration_bounds = array<i64: 1>, scalar_prefetch = 0 : i64, scratch_operands = 0 : i64, tpu.core_type = #tpu.core_type<tc>, window_params = [{transform_indices = @transform_0, window_bounds = array<i64: 8, 784>}, {pipeline_mode = #tpu.pipeline_mode<synchronous>, transform_indices = @transform_1, window_bounds = array<i64: 784, 128>}, {pipeline_mode = #tpu.pipeline_mode<synchronous>, transform_indices = @transform_2, window_bounds = array<i64: 1, 128>}, {pipeline_mode = #tpu.pipeline_mode<synchronous>, transform_indices = @transform_3, window_bounds = array<i64: 128, 128>}, {pipeline_mode = #tpu.pipeline_mode<synchronous>, transform_indices = @transform_4, window_bounds = array<i64: 1, 128>}, {transform_indices = @transform_5, window_bounds = array<i64: 8, 128>}]} {
    %c0 = arith.constant 0 : index
    %c0_0 = arith.constant 0 : index
    %0 = vector.load %arg1[%c0, %c0_0] : memref<8x784xf32, #tpu.memory_space<vmem>>, vector<8x784xf32>
    %1 = arith.truncf %0 : vector<8x784xf32> to vector<8x784xbf16>
    %c0_1 = arith.constant 0 : index
    %c0_2 = arith.constant 0 : index
    %2 = vector.load %arg2[%c0_1, %c0_2] : memref<784x128xbf16, #tpu.memory_space<vmem>>, vector<784x128xbf16>
    %cst = arith.constant dense<0.000000e+00> : vector<8x128xf32>
    %3 = tpu.matmul %1, %2, %cst {dimension_numbers = #tpu.dot_dimension_numbers<[1], [0], [0], [1], [0, 0, 1, 1], [], []>} : vector<8x784xbf16>, vector<784x128xbf16>, vector<8x128xf32> -> vector<8x128xf32>
    %c0_3 = arith.constant 0 : index
    %c0_4 = arith.constant 0 : index
    %4 = vector.load %arg3[%c0_3, %c0_4] : memref<1x128xf32, #tpu.memory_space<vmem>>, vector<1x128xf32>
    %5 = vector.broadcast %4 : vector<1x128xf32> to vector<8x128xf32>
    %6 = arith.addf %3, %5 : vector<8x128xf32>
    %cst_5 = arith.constant 0.000000e+00 : f32
    %7 = vector.broadcast %cst_5 : f32 to vector<8x128xf32>
    %8 = arith.maximumf %6, %7 : vector<8x128xf32>
    %9 = arith.truncf %8 : vector<8x128xf32> to vector<8x128xbf16>
    %c0_6 = arith.constant 0 : index
    %c0_7 = arith.constant 0 : index
    %10 = vector.load %arg4[%c0_6, %c0_7] : memref<128x128xbf16, #tpu.memory_space<vmem>>, vector<128x128xbf16>
    %cst_8 = arith.constant dense<0.000000e+00> : vector<8x128xf32>
    %11 = tpu.matmul %9, %10, %cst_8 {dimension_numbers = #tpu.dot_dimension_numbers<[1], [0], [0], [1], [0, 0, 1, 1], [], []>} : vector<8x128xbf16>, vector<128x128xbf16>, vector<8x128xf32> -> vector<8x128xf32>
    %c0_9 = arith.constant 0 : index
    %c0_10 = arith.constant 0 : index
    %12 = vector.load %arg5[%c0_9, %c0_10] : memref<1x128xf32, #tpu.memory_space<vmem>>, vector<1x128xf32>
    %13 = vector.broadcast %12 : vector<1x128xf32> to vector<8x128xf32>
    %14 = arith.addf %11, %13 : vector<8x128xf32>
    %15 = arith.truncf %14 : vector<8x128xf32> to vector<8x128xbf16>
    %c0_11 = arith.constant 0 : index
    %c0_12 = arith.constant 0 : index
    %16 = vector.load %arg6[%c0_11, %c0_12] : memref<8x128xbf16, #tpu.memory_space<vmem>>, vector<8x128xbf16>
    tpu.vector_store %arg6[%c0_11, %c0_12], %15 {strides = array<i32>} : memref<8x128xbf16, #tpu.memory_space<vmem>>, vector<8x128xbf16>,
    return
  }
  func.func @transform_0(%arg0: i32) -> (i32, i32) {
    %c0_i32 = arith.constant 0 : i32
    %c0_i32_0 = arith.constant 0 : i32
    return %arg0, %c0_i32 : i32, i32
  }
  func.func @transform_1(%arg0: i32) -> (i32, i32) {
    %c0_i32 = arith.constant 0 : i32
    %c0_i32_0 = arith.constant 0 : i32
    %c0_i32_1 = arith.constant 0 : i32
    return %c0_i32, %c0_i32_0 : i32, i32
  }
  func.func @transform_2(%arg0: i32) -> (i32, i32) {
    %c0_i32 = arith.constant 0 : i32
    %c0_i32_0 = arith.constant 0 : i32
    %c0_i32_1 = arith.constant 0 : i32
    return %c0_i32, %c0_i32_0 : i32, i32
  }
  func.func @transform_3(%arg0: i32) -> (i32, i32) {
    %c0_i32 = arith.constant 0 : i32
    %c0_i32_0 = arith.constant 0 : i32
    %c0_i32_1 = arith.constant 0 : i32
    return %c0_i32, %c0_i32_0 : i32, i32
  }
  func.func @transform_4(%arg0: i32) -> (i32, i32) {
    %c0_i32 = arith.constant 0 : i32
    %c0_i32_0 = arith.constant 0 : i32
    %c0_i32_1 = arith.constant 0 : i32
    return %c0_i32, %c0_i32_0 : i32, i32
  }
  func.func @transform_5(%arg0: i32) -> (i32, i32) {
    %c0_i32 = arith.constant 0 : i32
    %c0_i32_0 = arith.constant 0 : i32
    return %arg0, %c0_i32 : i32, i32
  }
}

</mosaic_0001>

<bundles_post_ra>
// kernel: simplenet_forward.1
= control target key start
LH: loop header
LB: loop body
LE: loop exit
PB: predicated region body
PF: predicated region fallthrough
CT: control target
= control target key end

     0   :  { %10 = vsyncpa [#allocation3], 0  ;;  %s1151_s18 = smov [#allocation2]   ;;  %s1284_s0 = inlined_call_operand.vmem [shape: f32[2,784], index: 0, kind: input, shape index: {}]   ;;  %s1285_s1 = inlined_call_operand.hbm [shape: bf16[784,128], index: 1, kind: input, shape index: {}]   ;;  %s1286_s2 = inlined_call_operand.vmem [shape: f32[1,128], index: 2, kind: input, shape index: {}]   ;;  %s1287_s3 = inlined_call_operand.vmem [shape: bf16[128,128], index: 3, kind: input, shape index: {}]   ;;  %s1288_s4 = inlined_call_operand.vmem [shape: f32[1,128], index: 4, kind: input, shape index: {}]   ;;  %s1289_s5 = inlined_call_operand.vmem [shape: bf16[2,128], index: 5, kind: output, shape index: {}]  }
   0x1   :  { %s18_s19 = sshll.u32 %s1151_s18, 4  ;;  %s1127_s22 = scalar_lea.hbm %s1285_s1, 6272  ;;  %s19_s19 = int_to_ptr.vmem [resolvable:$true] %s18_s19 }
   0x2   :  { %p1128_p0 = scmp.ne.s32.totalorder %s1285_s1, %s1127_s22  ;;  %p1131_p1 = scmp.lt.u32.totalorder %s1127_s22, %s1285_s1 }
   0x4   :  { %p1133_p2 = pnand %p1131_p1, %p1128_p0 }
   0x6   :  { %1136 = shalt.err (!%p1133_p2)
}
   0x7   :  { %s1137_s27 = scalar_lea.vmem %s19_s19, 6272  ;;  %p1142_p4 = scmp.lt.s32.totalorder %s19_s19, %s19_s19 }
   0x8   :  { %p1138_p3 = scmp.ne.s32.totalorder %s19_s19, %s1137_s27  ;;  %p1143_p5 = scmp.lt.s32.totalorder %s1137_s27, %s1137_s27 }
   0xa   :  { %p1144_p6 = por %p1143_p5, %p1142_p4 }
   0xc   :  { %p1145_p7 = pnand %p1144_p6, %p1138_p3 }
   0xe   :  { %1148 = shalt.err (!%p1145_p7)
}
   0xf   :  { %s1152_s28 = smov 64   ;;  %s1153_s29 = smov 4  }
  0x10   :  { %24 = dma.hbm_to_vmem [thread:$0]  %s1285_s1, 6272, %s19_s19, [#allocation3], %s1152_s28, %s1152_s28, %s1153_s29  }
  0x11   :  { %1149 = dma.done.wait [#allocation3], 6272  }
  0x12   :  { %1150 = vsyncadd [#allocation3], 4294961024  ;;  %v1058_v0 = vld [vmem:[#allocation2 + $0x40] sm:$0xff]   ;;  %v1062_v4 = vld [vmem:[#allocation2 + $0x48] sm:$0xff]   ;;  %v1154_v23 = vmov 1983009808   ;;  %v58_v25 = vlaneseq }
  0x13   :  { %v1059_v1 = vld [vmem:[#allocation2] sm:$0xff]   ;;  %948 = vmatprep.subr.bf16.mxu0 %v1058_v0  ;;  %v1063_v5 = vld [vmem:[#allocation2 + $0x8] sm:$0xff]   ;;  %v1066_v8 = vld [vmem:[#allocation2 + $0x50] sm:$0xff]   ;;  %v56_v24 = vunpack.c.l.s4 %v1154_v23  ;;  %v1155_v47 = vmov 0.0   ;;  %vm1156_vm0 = vmmov 0   ;;  %vm535_vm1 = vcmask 130048  }
  0x14   :  { %v1060_v2 = vld [vmem:[#allocation2 + $0xc0] sm:$0xff]   ;;  %949 = vmatpush3.bf16.msra.mxu0 %v1059_v1  ;;  %v1064_v6 = vld [vmem:[#allocation2 + $0xc8] sm:$0xff]   ;;  %v1067_v9 = vld [vmem:[#allocation2 + $0x10] sm:$0xff]   ;;  %v1200_v31 = vshrl.u32 %v58_v25, 7 }
  0x15   :  { %v1061_v3 = vld [vmem:[#allocation2 + $0x80] sm:$0xff]   ;;  %970 = vmatprep.subr.bf16.mxu1 %v1060_v2  ;;  %950 = vmatprep.subr.bf16.mxu0 %v1062_v4  ;;  %v1065_v7 = vld [vmem:[#allocation2 + $0x88] sm:$0xff]   ;;  %v1068_v10 = vld [vmem:[#allocation2 + $0xd0] sm:$0xff]   ;;  %v57_v30 = vunpack.c.0.s8 %v56_v24 }
  0x16   :  { %971 = vmatpush3.bf16.msra.mxu1 %v1061_v3  ;;  %v1069_v11 = vld [vmem:[#allocation2 + $0x90] sm:$0xff]   ;;  %v1070_v12 = vld [vmem:[#allocation2 + $0x58] sm:$0xff]   ;;  %v1074_v16 = vld [vmem:[#allocation2 + $0x60] sm:$0xff]  }
  0x17   :  { %972 = vmatprep.subr.bf16.mxu1 %v1064_v6  ;;  %v1071_v13 = vld [vmem:[#allocation2 + $0x18] sm:$0xff]   ;;  %v1075_v17 = vld [vmem:[#allocation2 + $0x20] sm:$0xff]   ;;  %v1078_v20 = vld [vmem:[#allocation2 + $0x68] sm:$0xff]   ;;  %v1203_v36 = vsub.s32 %v57_v30, %v1200_v31 }
  0x18   :  { %951 = vmatpush3.bf16.msra.mxu0 %v1063_v5  ;;  %v1072_v14 = vld [vmem:[#allocation2 + $0xd8] sm:$0xff]   ;;  %v1076_v18 = vld [vmem:[#allocation2 + $0xe0] sm:$0xff]   ;;  %v1079_v21 = vld [vmem:[#allocation2 + $0x28] sm:$0xff]  }
  0x19   :  { %952 = vmatprep.subr.bf16.mxu0 %v1066_v8  ;;  %v1073_v15 = vld [vmem:[#allocation2 + $0x98] sm:$0xff]   ;;  %v1077_v19 = vld [vmem:[#allocation2 + $0xa0] sm:$0xff]   ;;  %v1080_v22 = vld [vmem:[#allocation2 + $0xe8] sm:$0xff]  }
  0x1a   :  { %973 = vmatpush3.bf16.msra.mxu1 %v1065_v7  ;;  %v1081_v26 = vld [vmem:[#allocation2 + $0xa8] sm:$0xff]   ;;  %v1082_v27 = vld [vmem:[#allocation2 + $0x70] sm:$0xff]   ;;  %v1086_v33 = vld [vmem:[#allocation2 + $0x78] sm:$0xff]  }
  0x1b   :  { %974 = vmatprep.subr.bf16.mxu1 %v1068_v10  ;;  %v1083_v28 = vld [vmem:[#allocation2 + $0x30] sm:$0xff]   ;;  %v1087_v34 = vld [vmem:[#allocation2 + $0x38] sm:$0xff]   ;;  %v1094_v42 = vld [vmem:[#allocation2 + $0x140] sm:$0xff]  }
  0x1c   :  { %953 = vmatpush3.bf16.msra.mxu0 %v1067_v9  ;;  %v1084_v29 = vld [vmem:[#allocation2 + $0xf0] sm:$0xff]   ;;  %v1088_v35 = vld [vmem:[#allocation2 + $0xf8] sm:$0xff]   ;;  %v1097_v52 = vld [vmem:[#allocation2 + $0x100] sm:$0xff]  }
  0x1d   :  { %954 = vmatprep.subr.bf16.mxu0 %v1070_v12  ;;  %v1085_v32 = vld [vmem:[#allocation2 + $0xb0] sm:$0xff]   ;;  %v1091_v38 = vld [vmem:[%s1284_s0 + $0x1c] ss:$14 sps:$4 sm:$0xff]   ;;  %v1104_v63 = vld [vmem:[#allocation2 + $0x160] sm:$0xff]  }
  0x1e   :  { %975 = vmatpush3.bf16.msra.mxu1 %v1069_v11  ;;  %v1089_v37 = vld [vmem:[%s1284_s0] ss:$14 sps:$4 sm:$0xff]   ;;  %v1093_v39 = vld [vmem:[#allocation2 + $0xb8] sm:$0xff]   ;;  %v75_v41 = vrot.slane %v1091_v38, %v1203_v36  ;;  %v1095_v43 = vld [vmem:[%s1284_s0 + $0x4] ss:$14 sps:$4 sm:$0xff]  }
  0x1f   :  { %976 = vmatprep.subr.bf16.mxu1 %v1072_v14  ;;  %v61_v40 = vrot.slane %v1089_v37, %v1203_v36  ;;  %v1096_v44 = vld [vmem:[%s1284_s0 + $0x20] ss:$14 sps:$4 sm:$0xff]   ;;  %v68_v48 = vrot.slane %v1095_v43, %v1203_v36  ;;  %v1102_v61 = vld [vmem:[#allocation2 + $0x158] sm:$0xff]   ;;  %v1116_v5 = vld [vmem:[%s1284_s0 + $0x24] ss:$14 sps:$4 sm:$0xff]  }
  0x20   :  { %955 = vmatpush3.bf16.msra.mxu0 %v1071_v13  ;;  %v82_v49 = vrot.slane %v1096_v44, %v1203_v36  ;;  %v1098_v55 = vld [vmem:[#allocation2 + $0x148] sm:$0xff]   ;;  %v1100_v59 = vld [vmem:[#allocation2 + $0x150] sm:$0xff]   ;;  %v1103_v62 = vld [vmem:[#allocation2 + $0x118] sm:$0xff]   ;;  %v111_v10 = vrot.slane %v1116_v5, %v1203_v36 }
  0x21   :  { %956 = vmatprep.subr.bf16.mxu0 %v1074_v16  ;;  %v84_v45 = vcombine.high %v61_v40, %v75_v41  ;;  %v83_v46 = vcombine.low %v61_v40, %v75_v41  ;;  %v1099_v58 = vld [vmem:[#allocation2 + $0x108] sm:$0xff]   ;;  %v1101_v60 = vld [vmem:[#allocation2 + $0x110] sm:$0xff]   ;;  %v1112_v0 = vld [vmem:[#allocation2 + $0x180] sm:$0xff]  }
  0x22   :  { %977 = vmatpush3.bf16.msra.mxu1 %v1073_v15  ;;  %v86_v53 = vcombine.high %v68_v48, %v82_v49  ;;  %v85_v54 = vcombine.low %v68_v48, %v82_v49  ;;  %v1105_v1 = vld [vmem:[#allocation2 + $0x120] sm:$0xff]   ;;  %v1113_v2 = vld [vmem:[%s1284_s0 + $0x8] ss:$14 sps:$4 sm:$0xff]   ;;  %v1115_v3 = vld [vmem:[%s1284_s0 + $0xc] ss:$14 sps:$4 sm:$0x33]  }
  0x23   :  { %978 = vmatprep.subr.bf16.mxu1 %v1076_v18  ;;  %v130_v50 = vpack.c.bf16 %v84_v45, %v84_v45  ;;  %v129_v51 = vpack.c.bf16 %v83_v46, %v83_v46  ;;  %v1106_v4 = vld [vmem:[#allocation2 + $0x168] sm:$0xff]   ;;  %v97_v7 = vrot.slane %v1113_v2, %v1203_v36  ;;  %v104_v8 = vrot.slane %v1115_v3, %v1203_v36  ;;  %v1108_v12 = vld [vmem:[#allocation2 + $0x170] sm:$0xff]   ;;  %v1110_v18 = vld [vmem:[#allocation2 + $0x178] sm:$0xff]  }
  0x24   :  { %957 = vmatpush3.bf16.msra.mxu0 %v1075_v17  ;;  %v132_v56 = vpack.c.bf16 %v86_v53, %v86_v53  ;;  %v131_v57 = vpack.c.bf16 %v85_v54, %v85_v54  ;;  %v1118_v6 = vld [vmem:[%s1284_s0 + $0x28] ss:$14 sps:$4 sm:$0x33]   ;;  %v1122_v25 = vld [vmem:[%s1287_s3 + $0x18] sm:$0xff]  }
  0x25   :  { %958 = vmatprep.subr.bf16.mxu0 %v1078_v20  ;;  %571 = vmatprep.mubr.bf16.mxu0 %v130_v50  ;;  %v1107_v9 = vld [vmem:[#allocation2 + $0x128] sm:$0xff]   ;;  %v118_v11 = vrot.slane %v1118_v6, %v1203_v36  ;;  %v120_v13 = vcombine.high %v97_v7, %v111_v10  ;;  %v1109_v17 = vld [vmem:[#allocation2 + $0x130] sm:$0xff]   ;;  %v1111_v20 = vld [vmem:[#allocation2 + $0x138] sm:$0xff]  }
  0x26   :  { %979 = vmatpush3.bf16.msra.mxu1 %v1077_v19  ;;  %611 = vmatprep.mubr.bf16.mxu1 %v132_v56  ;;  %v119_v19 = vcombine.low %v97_v7, %v111_v10  ;;  %v1120_v23 = vld [vmem:[%s1287_s3 + $0x8] sm:$0xff]   ;;  %v1121_v24 = vld [vmem:[%s1287_s3 + $0x10] sm:$0xff]  }
  0x27   :  { %980 = vmatprep.subr.bf16.mxu1 %v1080_v22  ;;  %v121_v14 = vcombine.low %v104_v8, %v118_v11  ;;  %v134_v15 = vpack.c.bf16 %v120_v13, %v120_v13  ;;  %v1119_v22 = vld [vmem:[%s1287_s3] sm:$0xff]  }
  0x28   :  { %959 = vmatpush3.bf16.msra.mxu0 %v1079_v21  ;;  %v133_v21 = vpack.c.bf16 %v119_v19, %v119_v19 }
  0x29   :  { %960 = vmatprep.subr.bf16.mxu0 %v1082_v27  ;;  %v135_v16 = vpack.c.bf16 %v121_v14, %v121_v14  ;;  %v1124_v27 = vld [vmem:[%s1287_s3 + $0x28] sm:$0xff]  }
  0x2a   :  { %981 = vmatpush3.bf16.msra.mxu1 %v1081_v26  ;;  %v1123_v26 = vld [vmem:[%s1287_s3 + $0x20] sm:$0xff]  }
  0x2b   :  { %982 = vmatprep.subr.bf16.mxu1 %v1084_v29  ;;  %v1126_v29 = vld [vmem:[%s1287_s3 + $0x38] sm:$0xff]  }
  0x2c   :  { %961 = vmatpush3.bf16.msra.mxu0 %v1083_v28  ;;  %v1125_v28 = vld [vmem:[%s1287_s3 + $0x30] sm:$0xff]  }
  0x2d   :  { %962 = vmatprep.subr.bf16.mxu0 %v1086_v33 }
  0x2e   :  { %983 = vmatpush3.bf16.msra.mxu1 %v1085_v32  ;;  %v886_v32 = vld [vmem:[%s1286_s2] ss:$0 sm:$0xff] }
  0x2f   :  { %984 = vmatprep.subr.bf16.mxu1 %v1088_v35 }
  0x30   :  { %963 = vmatpush3.bf16.msra.mxu0 %v1087_v34 }
  0x31   :  { %992 = vmatprep.subr.bf16.mxu0 %v1094_v42 }
  0x32   :  { %985 = vmatpush3.bf16.msra.mxu1 %v1093_v39 }
  0x33   :  { %1025 = vmatprep.subr.bf16.mxu1 %v1155_v47  ;;  %572 = vmatmul.mubr.bf16.vlgmr.msra.gmra.mrb[0].mxu0 %v129_v51 }
  0x34   :  { %993 = vmatpush3.bf16.msra.mxu0 %v1097_v52  ;;  %651 = vmatprep.mubr.bf16.mxu0 %v134_v15 }
  0x35   :  { %994 = vmatprep.subr.bf16.mxu0 %v1098_v55  ;;  %612 = vmatmul.mubr.bf16.vlgmr.msra.gmra.mrb[0].mxu1 %v131_v57  ;;  %v1157_v57 = vmov 1966171168  }
  0x36   :  { %1027 = vmatprep.mubr.msk.bf16.mxu1 %vm1156_vm0, %v1155_v47  ;;  %1026 = vmatpush3.bf16.msra.mxu1 %v1112_v0 }
  0x37   :  { %1031 = vmatprep.subr.bf16.mxu1 %v1155_v47 }
  0x38   :  { %995 = vmatpush3.bf16.msra.mxu0 %v1099_v58  ;;  %v815_v58 = vunpack.c.l.s4 %v1157_v57 }
  0x39   :  { %996 = vmatprep.subr.bf16.mxu0 %v1100_v59 }
  0x3a   :  { %v816_v59 = vunpack.c.0.s8 %v815_v58 }
  0x3c   :  { %997 = vmatpush3.bf16.msra.mxu0 %v1101_v60  ;;  %v937_v60 = vld [vmem:[%s1288_s4] ss:$0 sm:$0xff] }
  0x3d   :  { %998 = vmatprep.subr.bf16.mxu0 %v1102_v61  ;;  %1028 = vmatmul.mubr.msk.bf16.vlgmr.msra.gmra.mrb[4].mxu1 %vm535_vm1, %v135_v16 }
  0x3e   :  { %1047 = vmatprep.mubr.msk.bf16.mxu1 %vm1156_vm0, %v1155_v47  ;;  %1032 = vmatpush3.bf16.msra.mxu1 %v1119_v22 }
  0x3f   :  { %1033 = vmatprep.subr.bf16.mxu1 %v1155_v47 }
  0x40   :  { %999 = vmatpush3.bf16.msra.mxu0 %v1103_v62 }
  0x41   :  { %1000 = vmatprep.subr.bf16.mxu0 %v1104_v63  ;;  %v819_v63 = vsub.s32 %v816_v59, %v1200_v31 }
  0x42   :  { %1034 = vmatpush3.bf16.msra.mxu1 %v1120_v23 }
  0x43   :  { %1035 = vmatprep.subr.bf16.mxu1 %v1155_v47 }
  0x44   :  { %1001 = vmatpush3.bf16.msra.mxu0 %v1105_v1 }
  0x45   :  { %1002 = vmatprep.subr.bf16.mxu0 %v1106_v4 }
  0x46   :  { %1036 = vmatpush3.bf16.msra.mxu1 %v1121_v24 }
  0x47   :  { %1037 = vmatprep.subr.bf16.mxu1 %v1155_v47 }
  0x48   :  { %1003 = vmatpush3.bf16.msra.mxu0 %v1107_v9 }
  0x49   :  { %1004 = vmatprep.subr.bf16.mxu0 %v1108_v12 }
  0x4a   :  { %1038 = vmatpush3.bf16.msra.mxu1 %v1122_v25 }
  0x4b   :  { %1039 = vmatprep.subr.bf16.mxu1 %v1155_v47 }
  0x4c   :  { %1005 = vmatpush3.bf16.msra.mxu0 %v1109_v17 }
  0x4d   :  { %1006 = vmatprep.subr.bf16.mxu0 %v1110_v18 }
  0x4e   :  { %1040 = vmatpush3.bf16.msra.mxu1 %v1123_v26 }
  0x4f   :  { %1041 = vmatprep.subr.bf16.mxu1 %v1155_v47 }
  0x50   :  { %1007 = vmatpush3.bf16.msra.mxu0 %v1111_v20 }
  0x52   :  { %1042 = vmatpush3.bf16.msra.mxu1 %v1124_v27 }
  0x53   :  { %652 = vmatmul.mubr.bf16.vlgmr.msra.gmra.mrb[4].mxu0 %v133_v21  ;;  %1043 = vmatprep.subr.bf16.mxu1 %v1155_v47 }
  0x56   :  { %1044 = vmatpush3.bf16.msra.mxu1 %v1125_v28 }
  0x57   :  { %1045 = vmatprep.subr.bf16.mxu1 %v1155_v47 }
  0x5a   :  { %1046 = vmatpush3.bf16.msra.mxu1 %v1126_v29 }
 0x106   :  { %v964_v30 = vpop.f32.mrb[0].mxu0 }
 0x107   :  { %v965_v33 = vpop.f32.mrb[1].mxu0 }
 0x108   :  { %v966_v34 = vadd.f32 %v965_v33, %v964_v30  ;;  %v967_v35 = vpop.f32.mrb[2].mxu0  ;;  %v986_v36 = vpop.f32.mrb[0].mxu1 }
 0x109   :  { %v968_v37 = vpop.f32.mrb[3].mxu0  ;;  %v987_v39 = vpop.f32.mrb[1].mxu1 }
 0x10a   :  { %v574_v38 = vadd.f32 %v966_v34, %v886_v32  ;;  %v988_v40 = vadd.f32 %v987_v39, %v986_v36  ;;  %v989_v41 = vpop.f32.mrb[2].mxu1 }
 0x10b   :  { %v990_v42 = vpop.f32.mrb[3].mxu1 }
 0x10c   :  { %v614_v43 = vadd.f32 %v988_v40, %v574_v38 }
 0x110   :  { %v693_v44 = vpop.f32.mrb[4].mxu1 }
 0x111   :  { %v1029_v45 = vpop.f32.mrb[5].mxu1 }
 0x112   :  { %v696_v46 = vpop.f32.mrb[6].mxu1 }
 0x113   :  { %v1030_v47 = vpop.f32.mrb[7].mxu1 }
 0x126   :  { %v1008_v48 = vpop.f32.mrb[4].mxu0 }
 0x127   :  { %v1009_v49 = vpop.f32.mrb[5].mxu0 }
 0x128   :  { %v1010_v50 = vadd.f32 %v1009_v49, %v1008_v48  ;;  %v1011_v51 = vpop.f32.mrb[6].mxu0 }
 0x129   :  { %v1012_v52 = vpop.f32.mrb[7].mxu0 }
 0x12a   :  { %v654_v53 = vadd.f32 %v1010_v50, %v614_v43 }
 0x12c   :  { %v694_v54 = vadd.f32 %v693_v44, %v654_v53 }
 0x12e   :  { %v699_v55 = vmax.f32 %v694_v54, 0.0 }
 0x130   :  { %v700_v56 = vpack.c.bf16 %v699_v55, %v699_v55 }
 0x132   :  { %1048 = vmatmul.mubr.bf16.vlgmr.msra.gmra.mrb[8].mxu1 %v700_v56 }
 0x205   :  { %v806_v61 = vpop.f32.mrb[8].mxu1 }
 0x206   :  { %v807_v62 = vadd.f32 %v937_v60, %v806_v61  ;;  %v1049_v0 = vpop.f32.mrb[9].mxu1 }
 0x207   :  { %v809_v1 = vpop.f32.mrb[10].mxu1 }
 0x208   :  { %v812_v2 = vpack.c.bf16 %v807_v62, %v807_v62  ;;  %v1050_v3 = vpop.f32.mrb[11].mxu1 }
 0x20a   :  { %v820_v4 = vrot.slane %v812_v2, %v819_v63 }
 0x20c   :  { %946 = vst.sshfl [vmem:[#allocation4] sm:$0x1 pattern:$0x73625140] %v820_v4 }
 0x213   :  { %v863_v5 = vld [vmem:[#allocation4] sm:$0x1] }
 0x214   :  { %864 = vst [vmem:[%s1289_s5] sm:$0x1] %v863_v5 }
 0x215   :  { %881 = vsyncpa [#allocation3], 1 }

</bundles_post_ra>
